<compile_context>
chip_gen: v5e
topology: v5e:2x2
jax: 0.10.0
libtpu: 0.0.40
codegen_flags: <defaults>
</compile_context>

<pallas_src>
import jax
import jax.numpy as jnp
from jax.experimental import pallas as pl
from jax.experimental.pallas import tpu as pltpu

_TARGET_BLOCK_BYTES = 2 * 1024 * 1024  # ~2 MiB per block buffer


def _softplus_double_kernel(x_ref, o_ref):
    x = x_ref[...]                       # single load per vreg
    t = (x + x).astype(jnp.float32)      # tensor + tensor, f32 compute
    # Numerically-stable softplus: max(t,0) + log1p(exp(-|t|)).
    # exp/log1p hit the EUP (separate bundle slot); max/abs/add are VALU
    # filler under the DMA. Matches PyTorch beta=1/threshold=20 in f32.
    sp = jnp.maximum(t, 0.0) + jnp.log1p(jnp.exp(-jnp.abs(t)))
    o_ref[...] = sp.astype(o_ref.dtype)


def _pick_lane_width(n_elem):
    # Widest lane-dense (multiple-of-128) last dim that divides the element
    # count, capped at 1024.
    for w in (1024, 512, 256, 128):
        if n_elem % w == 0:
            return w
    return None


def simple_softplus_model(x):
    """Returns softplus(x + x), same shape/dtype as x.
    Element count must be a multiple of 128."""
    orig_shape = x.shape
    orig_dtype = x.dtype
    n_elem = x.size

    width = _pick_lane_width(n_elem)
    assert width is not None, "element count must be a multiple of 128"

    rows = n_elem // width
    slab = x.reshape(rows, width)        # lane-dense 2D slab, no padding

    itemsize = jnp.dtype(orig_dtype).itemsize
    # ~2 MiB per buffer => <=8 MiB with in+out double-buffered; inside v5e's
    # 16 MiB default scoped VMEM and comfortable on v6e/v7x.
    block_rows = _TARGET_BLOCK_BYTES // (width * itemsize)
    block_rows = (block_rows // 32) * 32  # multiple of 32: covers f32/bf16/int8 sublane tiles
    if block_rows <= 0 or block_rows >= rows:
        block_rows = rows                 # block == full extent is always legal

    # Fixed tile + cdiv grid: Pallas masks the partial tail block, so ragged
    # row counts stay pipelined instead of collapsing to one giant block.
    grid = (pl.cdiv(rows, block_rows),)

    out = pl.pallas_call(
        _softplus_double_kernel,
        out_shape=jax.ShapeDtypeStruct((rows, width), orig_dtype),
        grid=grid,
        in_specs=[pl.BlockSpec((block_rows, width), lambda i: (i, 0))],
        out_specs=pl.BlockSpec((block_rows, width), lambda i: (i, 0)),
        compiler_params=pltpu.CompilerParams(
            dimension_semantics=("parallel",),  # shards across v7x's 2 TCs
        ),
    )(slab)

    return out.reshape(orig_shape)


if __name__ == "__main__":
    key = jax.random.PRNGKey(0)
    x = jax.random.normal(key, (2, 4, 16, 16), dtype=jnp.float32)

    y = simple_softplus_model(x)
    y = jax.block_until_ready(y)

    # Reference (PyTorch softplus semantics: beta=1, threshold=20)
    t = x + x
    ref = jnp.where(t > 20.0, t, jnp.log1p(jnp.exp(t)))
    assert y.shape == x.shape and y.dtype == x.dtype
    assert jnp.allclose(y, ref, atol=1e-6, rtol=1e-6)

    print("KERNEL_OK")
</pallas_src>

<mosaic_0001>
module attributes {stable_mosaic.version = 11 : i64} {
  func.func @_softplus_double_kernel(%arg0: i32, %arg1: memref<2x1024xf32, #tpu.memory_space<vmem>>, %arg2: memref<2x1024xf32, #tpu.memory_space<vmem>>) attributes {dimension_semantics = [#tpu.dimension_semantics<parallel>], iteration_bounds = array<i64: 1>, scalar_prefetch = 0 : i64, scratch_operands = 0 : i64, tpu.core_type = #tpu.core_type<tc>, window_params = [{transform_indices = @transform_0, window_bounds = array<i64: 2, 1024>}, {transform_indices = @transform_1, window_bounds = array<i64: 2, 1024>}]} {
    %c0 = arith.constant 0 : index
    %c0_0 = arith.constant 0 : index
    %0 = vector.load %arg1[%c0, %c0_0] : memref<2x1024xf32, #tpu.memory_space<vmem>>, vector<2x1024xf32>
    %1 = arith.addf %0, %0 : vector<2x1024xf32>
    %cst = arith.constant 0.000000e+00 : f32
    %2 = vector.broadcast %cst : f32 to vector<2x1024xf32>
    %3 = arith.maximumf %1, %2 : vector<2x1024xf32>
    %4 = math.absf %1 : vector<2x1024xf32>
    %cst_1 = arith.constant 0.000000e+00 : f32
    %5 = vector.broadcast %cst_1 : f32 to vector<2x1024xf32>
    %6 = arith.subf %5, %4 : vector<2x1024xf32>
    %7 = math.exp %6 : vector<2x1024xf32>
    %8 = math.log1p %7 : vector<2x1024xf32>
    %9 = arith.addf %3, %8 : vector<2x1024xf32>
    %c0_2 = arith.constant 0 : index
    %c0_3 = arith.constant 0 : index
    %10 = vector.load %arg2[%c0_2, %c0_3] : memref<2x1024xf32, #tpu.memory_space<vmem>>, vector<2x1024xf32>
    tpu.vector_store %arg2[%c0_2, %c0_3], %9 {strides = array<i32>} : memref<2x1024xf32, #tpu.memory_space<vmem>>, vector<2x1024xf32>,
    return
  }
  func.func @transform_0(%arg0: i32) -> (i32, i32) {
    %c0_i32 = arith.constant 0 : i32
    %c0_i32_0 = arith.constant 0 : i32
    return %arg0, %c0_i32 : i32, i32
  }
  func.func @transform_1(%arg0: i32) -> (i32, i32) {
    %c0_i32 = arith.constant 0 : i32
    %c0_i32_0 = arith.constant 0 : i32
    return %arg0, %c0_i32 : i32, i32
  }
}

</mosaic_0001>

<bundles_post_ra>
// kernel: tpu_custom_call.1
= control target key start
LH: loop header
LB: loop body
LE: loop exit
PB: predicated region body
PF: predicated region fallthrough
CT: control target
= control target key end

     0   :  { %6 = vsyncpa [#allocation3], 0  ;;  %s156_s0 = inlined_call_operand.hbm [shape: f32[2,1024], index: 0, kind: input, shape index: {}]   ;;  %s157_s1 = inlined_call_operand.hbm [shape: f32[2,1024], index: 1, kind: output, shape index: {}]  }
   0x1   :  { %7 = vsyncpa [#allocation4], 0  ;;  %s13_s8 = sshll.u32 %s156_s0, 4  ;;  %s138_s9 = smov [#allocation2]   ;;  %s14_s8 = int_to_ptr.hbm [resolvable:$true] %s13_s8 }
   0x2   :  { %s15_s10 = sshll.u32 %s138_s9, 4  ;;  %s16_s10 = int_to_ptr.vmem [resolvable:$true] %s15_s10 }
   0x3   :  { %18 = dma.hbm_to_vmem [thread:$0]  %s14_s8, 256, %s16_s10, [#allocation3]  }
   0x4   :  { %134 = dma.done.wait [#allocation3], 256  }
   0x5   :  { %135 = vsyncadd [#allocation3], 4294967040  ;;  %v23_v0 = vld [vmem:[#allocation2] sm:$0xff]  ;;  %v24_v1 = vld [vmem:[#allocation2 + $0x8] sm:$0xff]  ;;  %s139_s0 = smov [#allocation5]   ;;  %s66_s14 = sshll.u32 %s157_s1, 4  ;;  %s67_s14 = int_to_ptr.hbm [resolvable:$true] %s66_s14 }
   0x6   :  { %v25_v2 = vadd.f32 %v23_v0, %v23_v0  ;;  %v26_v3 = vadd.f32 %v24_v1, %v24_v1  ;;  %s64_s11 = sshll.u32 %s139_s0, 4  ;;  %s65_s11 = int_to_ptr.vmem [resolvable:$true] %s64_s11 }
   0x8   :  { %v29_v4 = vand.u32 2147483647, %v25_v2  ;;  %v30_v5 = vand.u32 2147483647, %v26_v3  ;;  %v27_v22 = vmax.f32 %v25_v2, 0.0  ;;  %v28_v26 = vmax.f32 %v26_v3, 0.0 }
   0xa   :  { %v31_v6 = vsub.f32 0.0, %v29_v4  ;;  %v32_v7 = vsub.f32 0.0, %v30_v5 }
   0xc   :  { %v33_v8 = vmul.f32 1.442695, %v31_v6  ;;  %v35_v9 = vmul.f32 1.442695, %v32_v7 }
   0xe   :  { %78 = vpow2.f32 %v33_v8 }
   0xf   :  { %80 = vpow2.f32 %v35_v9 }
  0x14   :  { %v79_v10 = vpop.eup %78 }
  0x15   :  { %v81_v11 = vpop.eup %80  ;;  %v37_v12 = vadd.f32 1.0, %v79_v10  ;;  %v40_v13 = vmul.f32 -0.5, %v79_v10  ;;  %v43_v17 = vand.u32 2147483647, %v79_v10 }
  0x16   :  { %v46_v14 = vadd.f32 1.0, %v81_v11  ;;  %v49_v15 = vmul.f32 -0.5, %v81_v11  ;;  %v52_v19 = vand.u32 2147483647, %v81_v11 }
  0x17   :  { %82 = vlog2.f32 %v37_v12  ;;  %v41_v16 = vadd.f32 1.0, %v40_v13  ;;  %vm44_vm0 = vcmp.lt.f32.partialorder %v43_v17, 0.0004427343 }
  0x18   :  { %84 = vlog2.f32 %v46_v14  ;;  %v50_v18 = vadd.f32 1.0, %v49_v15  ;;  %vm53_vm1 = vcmp.lt.f32.partialorder %v52_v19, 0.0004427343 }
  0x19   :  { %v42_v20 = vmul.f32 %v79_v10, %v41_v16 }
  0x1a   :  { %v51_v23 = vmul.f32 %v81_v11, %v50_v18 }
  0x1d   :  { %v83_v21 = vpop.eup %82 }
  0x1e   :  { %v85_v24 = vpop.eup %84  ;;  %v39_v25 = vmul.f32 0.6931472, %v83_v21 }
  0x1f   :  { %v48_v27 = vmul.f32 0.6931472, %v85_v24 }
  0x20   :  { %v45_v28 = vsel %vm44_vm0, %v42_v20, %v39_v25 }
  0x21   :  { %v55_v29 = vadd.f32 %v45_v28, %v27_v22  ;;  %v54_v30 = vsel %vm53_vm1, %v51_v23, %v48_v27 }
  0x22   :  { %v56_v31 = vadd.f32 %v54_v30, %v28_v26 }
  0x23   :  { %57 = vst [vmem:[#allocation5] sm:$0xff] %v55_v29 }
  0x24   :  { %58 = vst [vmem:[#allocation5 + $0x8] sm:$0xff] %v56_v31 }
  0x25   :  { %69 = dma.vmem_to_hbm [thread:$0]  %s65_s11, 256, %s67_s14, [#allocation4]  }
  0x26   :  { %136 = dma.done.wait [#allocation4], 256  }
  0x27   :  { %137 = vsyncadd [#allocation4], 4294967040 }
  0x28   :  { %74 = vsyncpa [#allocation3], 1 }
  0x29   :  { %75 = vsyncpa [#allocation4], 1 }

</bundles_post_ra>
